<compile_context>
chip_gen: v5e
topology: v5e:2x2
jax: 0.10.0
libtpu: 0.0.40
codegen_flags: <defaults>
</compile_context>

<pallas_src>
import functools
import math

import jax
import jax.numpy as jnp
from jax import lax
from jax.experimental import pallas as pl
from jax.experimental.pallas import tpu as pltpu


def _tap_weights(kernel_size, gaussian):
    """Static 1-D tap weights (box: all ones; gaussian: normalized taps)."""
    if not gaussian:
        return tuple(1.0 for _ in range(kernel_size))
    mean = (kernel_size - 1) / 2.0
    var = (kernel_size / 6.0) ** 2
    g = [math.exp(-((j - mean) ** 2) / (2.0 * var)) for j in range(kernel_size)]
    s = sum(g)
    return tuple(w / s for w in g)


def _separable_low_pass(x, *, weights, include_pad, gaussian):
    """k-tap separable low-pass of one (H, W) slab with zero padding."""
    H, W = x.shape
    k = len(weights)
    r = (k - 1) // 2
    row = lax.broadcasted_iota(jnp.int32, (H, W), 0)
    col = lax.broadcasted_iota(jnp.int32, (H, W), 1)

    def pass_1d(v, pos, n, axis):
        acc = v * weights[r]
        for d in range(1, r + 1):
            # neighbour at index i + d (zero when i + d >= n)
            plus = pltpu.roll(v, shift=n - d, axis=axis)
            acc = acc + jnp.where(pos < n - d, plus * weights[r + d], 0.0)
            # neighbour at index i - d (zero when i - d < 0)
            minus = pltpu.roll(v, shift=d, axis=axis)
            acc = acc + jnp.where(pos >= d, minus * weights[r - d], 0.0)
        return acc

    s = pass_1d(x, row, H, 0)        # vertical taps   (sublane rolls, XLU)
    s = pass_1d(s, col, W, 1)        # horizontal taps (lane rolls, XLU)

    if gaussian:
        return s                     # gaussian taps already sum to 1
    if include_pad:                  # AvgPool2d(count_include_pad=True)
        return s * (1.0 / float(k * k))
    rc = (jnp.minimum(row, r) + jnp.minimum(H - 1 - row, r) + 1).astype(jnp.float32)
    cc = (jnp.minimum(col, r) + jnp.minimum(W - 1 - col, r) + 1).astype(jnp.float32)
    return s / (rc * cc)


def _filter_high_kernel(x_ref, o_ref, *, weights, include_pad, gaussian,
                        recursions, normalize):
    x = x_ref[0].astype(jnp.float32)             # (H, W), W on lanes
    low = functools.partial(_separable_low_pass, weights=weights,
                            include_pad=include_pad, gaussian=gaussian)
    for _ in range(recursions - 1):              # FilterHigh pre-smoothing
        x = low(x)
    hi = x - low(x)
    if normalize:
        hi = 0.5 + 0.5 * hi
    o_ref[0] = hi.astype(o_ref.dtype)


def filter_high(img, *, recursions=1, kernel_size=5, include_pad=True,
                normalize=True, gaussian=False):
    """JAX/Pallas port of FilterHigh(...).forward (stride=1, odd kernel)."""
    assert kernel_size % 2 == 1, "stride=1 high-pass requires an odd kernel"
    B, C, H, W = img.shape
    x = img.reshape(B * C, H, W)                 # fold batch & channel -> grid axis
    weights = _tap_weights(kernel_size, gaussian)

    kernel = functools.partial(
        _filter_high_kernel, weights=weights, include_pad=bool(include_pad),
        gaussian=bool(gaussian), recursions=int(recursions),
        normalize=bool(normalize))

    # Per-step VMEM: double-buffered (1,H,W) in/out slabs + a few slab-sized
    # temporaries.  Keep the limit tied to the real working set (v7x: 64 MiB).
    # TODO(synk): for very large H*W (slab >> a few MiB), add an H-tile grid
    # axis with a (kernel_size-1)//2 row halo instead of whole-slab blocks.
    slab_bytes = 4 * H * W
    vmem_limit = int(min(64 << 20, max(16 << 20, 16 * slab_bytes)))

    out = pl.pallas_call(
        kernel,
        out_shape=jax.ShapeDtypeStruct((B * C, H, W), img.dtype),
        grid_spec=pltpu.PrefetchScalarGridSpec(
            num_scalar_prefetch=0,
            grid=(B * C,),
            in_specs=[pl.BlockSpec((1, H, W), lambda i: (i, 0, 0))],
            out_specs=pl.BlockSpec((1, H, W), lambda i: (i, 0, 0)),
        ),
        compiler_params=pltpu.CompilerParams(
            dimension_semantics=("parallel",),
            vmem_limit_bytes=vmem_limit,
        ),
    )(x)
    return out.reshape(B, C, H, W)


def _ref_filter_high(img, *, recursions=1, kernel_size=5, include_pad=True,
                     normalize=True, gaussian=False):
    """Pure-JAX reference matching the PyTorch forward."""
    B, C, H, W = img.shape
    p = (kernel_size - 1) // 2
    x = img.astype(jnp.float32)

    if gaussian:
        w1 = jnp.asarray(_tap_weights(kernel_size, True), jnp.float32)
        w2 = jnp.outer(w1, w1)                          # == 2-D kernel / its sum
        w = jnp.tile(w2[None, None], (C, 1, 1, 1))      # (C, 1, k, k) depthwise

        def low(v):
            return lax.conv_general_dilated(
                v, w, window_strides=(1, 1), padding=[(p, p), (p, p)],
                dimension_numbers=("NCHW", "OIHW", "NCHW"),
                feature_group_count=C, precision=lax.Precision.HIGHEST)
    else:
        def low(v):
            s = lax.reduce_window(v, 0.0, lax.add,
                                  (1, 1, kernel_size, kernel_size),
                                  (1, 1, 1, 1),
                                  [(0, 0), (0, 0), (p, p), (p, p)])
            if include_pad:
                return s / float(kernel_size * kernel_size)
            cnt = lax.reduce_window(jnp.ones_like(v), 0.0, lax.add,
                                    (1, 1, kernel_size, kernel_size),
                                    (1, 1, 1, 1),
                                    [(0, 0), (0, 0), (p, p), (p, p)])
            return s / cnt

    for _ in range(recursions - 1):
        x = low(x)
    hi = x - low(x)
    if normalize:
        hi = 0.5 + 0.5 * hi
    return hi.astype(img.dtype)


if __name__ == "__main__":
    key = jax.random.PRNGKey(0)
    B, C, H, W = 2, 3, 64, 128                      # RGB-like image, lane-dense W
    img = jax.random.uniform(key, (B, C, H, W), jnp.float32)

    # Default FilterHigh config: 5x5 box low-pass, recursions=1, normalize=True.
    fh = jax.jit(filter_high)
    out = jax.block_until_ready(fh(img))
    ref = _ref_filter_high(img)
    assert out.shape == (B, C, H, W)
    err = float(jnp.max(jnp.abs(out - ref)))
    assert err <= 1e-4, f"box path mismatch: {err}"

    # Also exercise the gaussian low-pass / multi-recursion / no-normalize path.
    out_g = jax.block_until_ready(
        filter_high(img, recursions=2, gaussian=True, normalize=False))
    ref_g = _ref_filter_high(img, recursions=2, gaussian=True, normalize=False)
    err_g = float(jnp.max(jnp.abs(out_g - ref_g)))
    assert err_g <= 1e-4, f"gaussian path mismatch: {err_g}"

    print("KERNEL_OK")
</pallas_src>

<mosaic_0001>
module attributes {stable_mosaic.version = 11 : i64} {
  func.func @_filter_high_kernel(%arg0: i32, %arg1: memref<1x64x128xf32, #tpu.memory_space<vmem>>, %arg2: memref<1x64x128xf32, #tpu.memory_space<vmem>>) attributes {dimension_semantics = [#tpu.dimension_semantics<parallel>], iteration_bounds = array<i64: 6>, scalar_prefetch = 0 : i64, scratch_operands = 0 : i64, tpu.core_type = #tpu.core_type<tc>, window_params = [{transform_indices = @transform_0, window_bounds = array<i64: 1, 64, 128>}, {transform_indices = @transform_1, window_bounds = array<i64: 1, 64, 128>}]} {
    %c0 = arith.constant 0 : index
    %c0_0 = arith.constant 0 : index
    %c0_1 = arith.constant 0 : index
    %0 = vector.load %arg1[%c0, %c0_0, %c0_1] : memref<1x64x128xf32, #tpu.memory_space<vmem>>, vector<1x64x128xf32>
    %1 = vector.shape_cast %0 : vector<1x64x128xf32> to vector<64x128xf32>
    %2 = tpu.iota {dimensions = array<i32: 0>} : vector<64x128xi32>
    %3 = tpu.iota {dimensions = array<i32: 1>} : vector<64x128xi32>
    %cst = arith.constant 1.000000e+00 : f32
    %4 = vector.broadcast %cst : f32 to vector<64x128xf32>
    %5 = arith.mulf %1, %4 : vector<64x128xf32>
    %c63_i32 = arith.constant 63 : i32
    %6 = tpu.dynamic_rotate %1 by %c63_i32 dim 0 : vector<64x128xf32>, i32 -> vector<64x128xf32>
    %c63_i32_2 = arith.constant 63 : i32
    %7 = vector.broadcast %c63_i32_2 : i32 to vector<64x128xi32>
    %8 = arith.cmpi slt, %2, %7 : vector<64x128xi32>
    %cst_3 = arith.constant 1.000000e+00 : f32
    %9 = vector.broadcast %cst_3 : f32 to vector<64x128xf32>
    %10 = arith.mulf %6, %9 : vector<64x128xf32>
    %cst_4 = arith.constant 0.000000e+00 : f32
    %11 = vector.broadcast %cst_4 : f32 to vector<64x128xf32>
    %12 = arith.select %8, %10, %11 : vector<64x128xi1>, vector<64x128xf32>
    %13 = arith.addf %5, %12 : vector<64x128xf32>
    %c1_i32 = arith.constant 1 : i32
    %14 = tpu.dynamic_rotate %1 by %c1_i32 dim 0 : vector<64x128xf32>, i32 -> vector<64x128xf32>
    %c1_i32_5 = arith.constant 1 : i32
    %15 = vector.broadcast %c1_i32_5 : i32 to vector<64x128xi32>
    %16 = arith.cmpi sge, %2, %15 : vector<64x128xi32>
    %cst_6 = arith.constant 1.000000e+00 : f32
    %17 = vector.broadcast %cst_6 : f32 to vector<64x128xf32>
    %18 = arith.mulf %14, %17 : vector<64x128xf32>
    %cst_7 = arith.constant 0.000000e+00 : f32
    %19 = vector.broadcast %cst_7 : f32 to vector<64x128xf32>
    %20 = arith.select %16, %18, %19 : vector<64x128xi1>, vector<64x128xf32>
    %21 = arith.addf %13, %20 : vector<64x128xf32>
    %c62_i32 = arith.constant 62 : i32
    %22 = tpu.dynamic_rotate %1 by %c62_i32 dim 0 : vector<64x128xf32>, i32 -> vector<64x128xf32>
    %c62_i32_8 = arith.constant 62 : i32
    %23 = vector.broadcast %c62_i32_8 : i32 to vector<64x128xi32>
    %24 = arith.cmpi slt, %2, %23 : vector<64x128xi32>
    %cst_9 = arith.constant 1.000000e+00 : f32
    %25 = vector.broadcast %cst_9 : f32 to vector<64x128xf32>
    %26 = arith.mulf %22, %25 : vector<64x128xf32>
    %cst_10 = arith.constant 0.000000e+00 : f32
    %27 = vector.broadcast %cst_10 : f32 to vector<64x128xf32>
    %28 = arith.select %24, %26, %27 : vector<64x128xi1>, vector<64x128xf32>
    %29 = arith.addf %21, %28 : vector<64x128xf32>
    %c2_i32 = arith.constant 2 : i32
    %30 = tpu.dynamic_rotate %1 by %c2_i32 dim 0 : vector<64x128xf32>, i32 -> vector<64x128xf32>
    %c2_i32_11 = arith.constant 2 : i32
    %31 = vector.broadcast %c2_i32_11 : i32 to vector<64x128xi32>
    %32 = arith.cmpi sge, %2, %31 : vector<64x128xi32>
    %cst_12 = arith.constant 1.000000e+00 : f32
    %33 = vector.broadcast %cst_12 : f32 to vector<64x128xf32>
    %34 = arith.mulf %30, %33 : vector<64x128xf32>
    %cst_13 = arith.constant 0.000000e+00 : f32
    %35 = vector.broadcast %cst_13 : f32 to vector<64x128xf32>
    %36 = arith.select %32, %34, %35 : vector<64x128xi1>, vector<64x128xf32>
    %37 = arith.addf %29, %36 : vector<64x128xf32>
    %cst_14 = arith.constant 1.000000e+00 : f32
    %38 = vector.broadcast %cst_14 : f32 to vector<64x128xf32>
    %39 = arith.mulf %37, %38 : vector<64x128xf32>
    %c127_i32 = arith.constant 127 : i32
    %40 = tpu.dynamic_rotate %37 by %c127_i32 dim 1 : vector<64x128xf32>, i32 -> vector<64x128xf32>
    %c127_i32_15 = arith.constant 127 : i32
    %41 = vector.broadcast %c127_i32_15 : i32 to vector<64x128xi32>
    %42 = arith.cmpi slt, %3, %41 : vector<64x128xi32>
    %cst_16 = arith.constant 1.000000e+00 : f32
    %43 = vector.broadcast %cst_16 : f32 to vector<64x128xf32>
    %44 = arith.mulf %40, %43 : vector<64x128xf32>
    %cst_17 = arith.constant 0.000000e+00 : f32
    %45 = vector.broadcast %cst_17 : f32 to vector<64x128xf32>
    %46 = arith.select %42, %44, %45 : vector<64x128xi1>, vector<64x128xf32>
    %47 = arith.addf %39, %46 : vector<64x128xf32>
    %c1_i32_18 = arith.constant 1 : i32
    %48 = tpu.dynamic_rotate %37 by %c1_i32_18 dim 1 : vector<64x128xf32>, i32 -> vector<64x128xf32>
    %c1_i32_19 = arith.constant 1 : i32
    %49 = vector.broadcast %c1_i32_19 : i32 to vector<64x128xi32>
    %50 = arith.cmpi sge, %3, %49 : vector<64x128xi32>
    %cst_20 = arith.constant 1.000000e+00 : f32
    %51 = vector.broadcast %cst_20 : f32 to vector<64x128xf32>
    %52 = arith.mulf %48, %51 : vector<64x128xf32>
    %cst_21 = arith.constant 0.000000e+00 : f32
    %53 = vector.broadcast %cst_21 : f32 to vector<64x128xf32>
    %54 = arith.select %50, %52, %53 : vector<64x128xi1>, vector<64x128xf32>
    %55 = arith.addf %47, %54 : vector<64x128xf32>
    %c126_i32 = arith.constant 126 : i32
    %56 = tpu.dynamic_rotate %37 by %c126_i32 dim 1 : vector<64x128xf32>, i32 -> vector<64x128xf32>
    %c126_i32_22 = arith.constant 126 : i32
    %57 = vector.broadcast %c126_i32_22 : i32 to vector<64x128xi32>
    %58 = arith.cmpi slt, %3, %57 : vector<64x128xi32>
    %cst_23 = arith.constant 1.000000e+00 : f32
    %59 = vector.broadcast %cst_23 : f32 to vector<64x128xf32>
    %60 = arith.mulf %56, %59 : vector<64x128xf32>
    %cst_24 = arith.constant 0.000000e+00 : f32
    %61 = vector.broadcast %cst_24 : f32 to vector<64x128xf32>
    %62 = arith.select %58, %60, %61 : vector<64x128xi1>, vector<64x128xf32>
    %63 = arith.addf %55, %62 : vector<64x128xf32>
    %c2_i32_25 = arith.constant 2 : i32
    %64 = tpu.dynamic_rotate %37 by %c2_i32_25 dim 1 : vector<64x128xf32>, i32 -> vector<64x128xf32>
    %c2_i32_26 = arith.constant 2 : i32
    %65 = vector.broadcast %c2_i32_26 : i32 to vector<64x128xi32>
    %66 = arith.cmpi sge, %3, %65 : vector<64x128xi32>
    %cst_27 = arith.constant 1.000000e+00 : f32
    %67 = vector.broadcast %cst_27 : f32 to vector<64x128xf32>
    %68 = arith.mulf %64, %67 : vector<64x128xf32>
    %cst_28 = arith.constant 0.000000e+00 : f32
    %69 = vector.broadcast %cst_28 : f32 to vector<64x128xf32>
    %70 = arith.select %66, %68, %69 : vector<64x128xi1>, vector<64x128xf32>
    %71 = arith.addf %63, %70 : vector<64x128xf32>
    %cst_29 = arith.constant 4.000000e-02 : f32
    %72 = vector.broadcast %cst_29 : f32 to vector<64x128xf32>
    %73 = arith.mulf %71, %72 : vector<64x128xf32>
    %74 = arith.subf %1, %73 : vector<64x128xf32>
    %cst_30 = arith.constant 5.000000e-01 : f32
    %75 = vector.broadcast %cst_30 : f32 to vector<64x128xf32>
    %76 = arith.mulf %75, %74 : vector<64x128xf32>
    %cst_31 = arith.constant 5.000000e-01 : f32
    %77 = vector.broadcast %cst_31 : f32 to vector<64x128xf32>
    %78 = arith.addf %77, %76 : vector<64x128xf32>
    %c0_32 = arith.constant 0 : index
    %c0_33 = arith.constant 0 : index
    %c0_34 = arith.constant 0 : index
    %79 = vector.load %arg2[%c0_32, %c0_33, %c0_34] : memref<1x64x128xf32, #tpu.memory_space<vmem>>, vector<1x64x128xf32>
    %80 = vector.shape_cast %79 : vector<1x64x128xf32> to vector<64x128xf32>
    %81 = vector.shape_cast %78 : vector<64x128xf32> to vector<1x64x128xf32>
    tpu.vector_store %arg2[%c0_32, %c0_33, %c0_34], %81 {strides = array<i32>} : memref<1x64x128xf32, #tpu.memory_space<vmem>>, vector<1x64x128xf32>,
    return
  }
  func.func @transform_0(%arg0: i32) -> (i32, i32, i32) {
    %c0_i32 = arith.constant 0 : i32
    %c0_i32_0 = arith.constant 0 : i32
    %c0_i32_1 = arith.constant 0 : i32
    return %arg0, %c0_i32, %c0_i32_0 : i32, i32, i32
  }
  func.func @transform_1(%arg0: i32) -> (i32, i32, i32) {
    %c0_i32 = arith.constant 0 : i32
    %c0_i32_0 = arith.constant 0 : i32
    %c0_i32_1 = arith.constant 0 : i32
    return %arg0, %c0_i32, %c0_i32_0 : i32, i32, i32
  }
}

</mosaic_0001>

<bundles_post_ra>
// kernel: filter_high.1
= control target key start
LH: loop header
LB: loop body
LE: loop exit
PB: predicated region body
PF: predicated region fallthrough
CT: control target
= control target key end

     0   :  { %6 = vsyncpa [#allocation3], 0  ;;  %s1240_s0 = inlined_call_operand.hbm [shape: f32[6,64,128], index: 0, kind: input, shape index: {}]   ;;  %s1241_s1 = inlined_call_operand.hbm [shape: f32[6,64,128], index: 1, kind: output, shape index: {}]  }
   0x1   :  { %8 = vsyncpa [#allocation3 + $0x1], 0 }
   0x2   :  { %9 = vsyncpa [#allocation4], 0 }
   0x3   :  { %11 = vsyncpa [#allocation4 + $0x1], 0  ;;  %s767_s6 = smov 0   ;;  %s769_s7 = smov 0  }
   0x4   :  { %s771_s8 = smov 0   ;;  %s773_s9 = smov 0  }
   0x5 LB: > { %s788_s10 = sadd.s32 4294967295, %s747_s9   ;;  %s581_s11 = sadd.s32 4294967294, %s747_s9   ;;  %s747_s9 = sphi %s773_s9, %s1250_s9   ;;  %s743_s8 = sphi %s771_s8, %s1249_s8   ;;  %s739_s7 = sphi %s769_s7, %s1248_s7   ;;  %s735_s6 = sphi %s767_s6, %s1247_s6  }
   0x6   : > { %s792_s12 = sadd.s32 1, %s747_s9   ;;  %s24_s13 = sadd.s32 1, %s743_s8 }
   0x7   : > { %s21_s14 = ssub.s32 %s747_s9, %s792_s12  ;;  %p31_p0 = scmp.ne.s32.totalorder %s743_s8, %s739_s7 }
   0x8   : > { %p22_p1 = scmp.eq.s32.totalorder %s21_s14, 0  ;;  %p32_p2 = scmp.eq.s32.totalorder %s747_s9, 0 }
   0x9   : > { %p37_p3 = scmp.ne.s32.totalorder %s739_s7, %s735_s6  ;;  %p38_p4 = scmp.eq.s32.totalorder %s788_s10, 0 }
   0xa   : > { %s804_s15 = scalar_select %p22_p1, %s743_s8, %s24_s13  }
   0xb   : > { %p806_p5 = por %p32_p2, %p31_p0  ;;  %p810_p6 = por %p38_p4, %p37_p3 }
   0xc   : > { %p61_p7 = scmp.eq.s32.totalorder %s788_s10, 5  ;;  %p67_p8 = scmp.eq.s32.totalorder %s581_s11, 5 }
   0xd   : > { %p609_p9 = scmp.lt.s32.totalorder %s747_s9, 6  ;;  %s87_s20 = sand.u32 1, %s743_s8  }
   0xe   : > { %p816_p10 = por %p61_p7, %p31_p0  ;;  %p820_p11 = por %p67_p8, %p37_p3 }
   0xf   : > { %s595_s21 = sshll.u32 %s747_s9, 6  ;;  %s584_s22 = sshll.u32 %s87_s20, 6 }
  0x10   : > { %s96_s25 = scalar_lea.hbm %s1240_s0, %s595_s21  ;;  %s91_s27 = scalar_lea.vmem [#allocation2], %s584_s22 }
  0x11   : > { %s97_s26 = sshll.u32 %s96_s25, 4  ;;  %s99_s28 = sshll.u32 %s91_s27, 4  ;;  %s98_s26 = int_to_ptr.hbm [resolvable:$true] %s97_s26  ;;  %s100_s28 = int_to_ptr.vmem [resolvable:$true] %s99_s28 }
  0x12   : > { %p831_p12 = pnand %p609_p9, %p806_p5  ;;  %p587_p13 = scmp.ge.s32.totalorder %s747_s9, 1 }
  0x13   : > { %p107_p0 = scmp.lt.s32.totalorder %s747_s9, 7  ;;  %s88_s30 = scalar_lea.sflag [#allocation3], %s87_s20 }
  0x14   : > { %s651_s2 = sshra.s32 %s98_s26, 4  ;;  %p655_p2 = pneg %p831_p12  ;;  %s652_s2 = int_to_ptr.hbm [resolvable:$true] %s651_s2 }
  0x15   : > { %s653_s3 = scalar_lea.hbm %s652_s2, 64  ;;  %s658_s11 = scalar_lea.hbm %s1240_s0, 384 }
  0x16   : > { %p654_p1 = scmp.ne.s32.totalorder %s652_s2, %s653_s3  ;;  %p659_p5 = scmp.lt.s32.totalorder %s652_s2, %s1240_s0 }
  0x17   : > { %p660_p7 = scmp.lt.s32.totalorder %s658_s11, %s653_s3 }
  0x18   : > { %p656_p3 = pnand %p655_p2, %p654_p1 }
  0x19   : > { %p661_p8 = por %p660_p7, %p659_p5 }
  0x1a   : > { %p657_p4 = pneg %p656_p3 }
  0x1c   : > { %p662_p9 = pnand %p661_p8, %p657_p4 }
  0x1e   : > { %665 = shalt.err (!%p662_p9)
}
  0x1f   : > { %s749_s16 = smov 128   ;;  %s750_s20 = smov 8  }
  0x20   : > { %604 = dma.hbm_to_vmem [thread:$0]  (!%p831_p12), %s98_s26, 1024, %s100_s28, %s88_s30, %s749_s16, %s749_s16, %s750_s20  }
  0x21   : > { %p108_p1 = pnand %p587_p13, %p107_p0 }
  0x22   : > { %s852_s21 = sand.u32 (!%p108_p1), 1, %s739_s7  }
  0x23   : > { %111 = sbr.rel (%p108_p1) target bundleno = 268 (0x10c), region = 24  ;;  %s588_s22 = sshll.u32 (!%p108_p1), %s852_s21, 6 }
  0x24   : > { %s114_s23 = scalar_lea.sflag (!%p108_p1), [#allocation3], %s852_s21  ;;  %s858_s24 = scalar_lea.vmem (!%p108_p1), [#allocation2], %s588_s22 }
  0x28   : > { %726 = dma.done.wait (%p810_p6), %s114_s23, 1024  }
  0x29   : > { %728 = vsyncadd (%p810_p6), %s114_s23, 4294966272  ;;  %v145_v0 = vlaneseq  ;;  %v872_v2 = vld [vmem:[%s858_s24 + $0x8] sm:$0xff]  ;;  %v875_v3 = vld [vmem:[%s858_s24 + $0x10] sm:$0xff]  ;;  %s751_s17 = smov 127   ;;  %s752_s25 = smov 1  }
  0x2a   : > { %v878_v4 = vld [vmem:[%s858_s24 + $0x18] sm:$0xff]  ;;  %v158_v6 = vrot.slane %v875_v3, 1  ;;  %v198_v8 = vrot.slane %v872_v2, 7  ;;  %v199_v9 = vrot.slane %v875_v3, 7  ;;  %v890_v10 = vld [vmem:[%s858_s24] sm:$0xff]  ;;  %v240_v11 = vrot.slane %v875_v3, 2 }
  0x2b   : > { %v865_v1 = vshrl.u32 %v145_v0, 7  ;;  %v159_v7 = vrot.slane %v878_v4, 1  ;;  %v241_v12 = vrot.slane %v878_v4, 2  ;;  %v280_v13 = vrot.slane %v872_v2, 6  ;;  %v897_v15 = vld [vmem:[%s858_s24 + $0x38] sm:$0xff]  ;;  %v912_v24 = vld [vmem:[%s858_s24 + $0x20] sm:$0xff] }
  0x2c   : > { %v281_v14 = vrot.slane %v875_v3, 6  ;;  %v156_v18 = vrot.slane %v890_v10, 1  ;;  %v157_v19 = vrot.slane %v872_v2, 1  ;;  %v197_v23 = vrot.slane %v890_v10, 7  ;;  %v952_v49 = vld [vmem:[%s858_s24 + $0x28] sm:$0xff]  ;;  %s753_s26 = smov 126  }
  0x2d   : > { %vm164_vm0 = vcmp.lt.s32.totalorder %v865_v1, 7  ;;  %vm205_vm1 = vcmp.lt.s32.totalorder %v865_v1, 1  ;;  %vm246_vm2 = vcmp.lt.s32.totalorder %v865_v1, 6  ;;  %vm287_vm3 = vcmp.lt.s32.totalorder %v865_v1, 2  ;;  %s754_s27 = smov 2   ;;  %s1144_s28 = scalar_lea.vmem [#allocation5], %s588_s22 }
  0x2e   : > { %vm214_vm4 = vcmp.ge.s32.totalorder %v865_v1, 1  ;;  %vm296_vm5 = vcmp.ge.s32.totalorder %v865_v1, 2  ;;  %v883_v5 = vadd.s32 56, %v865_v1  ;;  %v169_v16 = vsel %vm164_vm0, %v158_v6, %v159_v7  ;;  %s596_s29 = sshll.u32 %s788_s10, 6  ;;  %s505_s10 = sshll.u32 %s1144_s28, 4  ;;  %s506_s10 = int_to_ptr.vmem [resolvable:$true] %s505_s10 }
  0x2f   : > { %v211_v17 = vsel %vm205_vm1, %v198_v8, %v199_v9  ;;  %v191_v20 = vadd.f32 %v169_v16, %v875_v3  ;;  %v251_v21 = vsel %vm246_vm2, %v240_v11, %v241_v12  ;;  %v293_v22 = vsel %vm287_vm3, %v280_v13, %v281_v14  ;;  %s504_s3 = scalar_lea.hbm %s1241_s1, %s596_s29  ;;  %s493_s5 = scalar_lea.sflag [#allocation4], %s852_s21 }
  0x30   : > { %v171_v25 = vsel %vm164_vm0, %v156_v18, %v157_v19  ;;  %v204_v26 = vrot.slane %v897_v15, 7  ;;  %v238_v27 = vrot.slane %v890_v10, 2  ;;  %v239_v28 = vrot.slane %v872_v2, 2  ;;  %s507_s4 = sshll.u32 %s504_s3, 4  ;;  %s701_s20 = scalar_lea.hbm %s1241_s1, 384  ;;  %s508_s4 = int_to_ptr.hbm [resolvable:$true] %s507_s4 }
  0x31   : > { %v232_v29 = vadd.f32 %v211_v17, %v191_v20  ;;  %v189_v30 = vadd.f32 %v171_v25, %v890_v10  ;;  %v279_v31 = vrot.slane %v890_v10, 6  ;;  %v286_v32 = vrot.slane %v897_v15, 6  ;;  %s695_s11 = sshra.s32 %s508_s4, 4  ;;  %s696_s11 = int_to_ptr.hbm [resolvable:$true] %s695_s11 }
  0x32   : > { %v213_v33 = vsel %vm205_vm1, %v204_v26, %v197_v23  ;;  %v253_v34 = vsel %vm246_vm2, %v238_v27, %v239_v28  ;;  %v160_v35 = vrot.slane %v912_v24, 1  ;;  %v200_v36 = vrot.slane %v878_v4, 7  ;;  %s697_s13 = scalar_lea.hbm %s696_s11, 64  ;;  %p702_p0 = scmp.lt.s32.totalorder %s696_s11, %s1241_s1 }
  0x33   : > { %vm180_vm6 = vcmp.lt.s32.totalorder %v883_v5, 63  ;;  %v273_v37 = vadd.f32 %v251_v21, %v232_v29  ;;  %v222_v38 = vsel %vm214_vm4, %v213_v33, 0.0  ;;  %v295_v39 = vsel %vm287_vm3, %v286_v32, %v279_v31  ;;  %p698_p6 = scmp.ne.s32.totalorder %s696_s11, %s697_s13  ;;  %p703_p2 = scmp.lt.s32.totalorder %s701_s20, %s697_s13 }
  0x34   : > { %v242_v40 = vrot.slane %v912_v24, 2  ;;  %v230_v41 = vadd.f32 %v222_v38, %v189_v30  ;;  %v304_v42 = vsel %vm296_vm5, %v295_v39, 0.0  ;;  %v168_v43 = vsel %vm164_vm0, %v159_v7, %v160_v35  ;;  %v974_v7 = vld [vmem:[%s858_s24 + $0x30] sm:$0xff] }
  0x35   : > { %v210_v44 = vsel %vm205_vm1, %v199_v9, %v200_v36  ;;  %vm262_vm7 = vcmp.lt.s32.totalorder %v883_v5, 62  ;;  %v945_v45 = vadd.f32 %v293_v22, %v273_v37  ;;  %v192_v46 = vadd.f32 %v168_v43, %v878_v4  ;;  %p699_p12 = pnand %p698_p6, %p816_p10  ;;  %p704_p3 = por %p703_p2, %p702_p0 }
  0x36   : > { %v250_v47 = vsel %vm246_vm2, %v241_v12, %v242_v40  ;;  %v282_v48 = vrot.slane %v878_v4, 6  ;;  %v271_v50 = vadd.f32 %v253_v34, %v230_v41  ;;  %v170_v51 = vsel %vm164_vm0, %v157_v19, %v158_v6 }
  0x37   : > { %v212_v52 = vsel %vm205_vm1, %v197_v23, %v198_v8  ;;  %v252_v53 = vsel %vm246_vm2, %v239_v28, %v240_v11  ;;  %324 = vrot.lane.b32.xlu1 %v945_v45, %s751_s17  ;;  %v233_v54 = vadd.f32 %v210_v44, %v192_v46  ;;  %v190_v56 = vadd.f32 %v170_v51, %v872_v2  ;;  %p700_p13 = pneg %p699_p12 }
  0x38   : > { %v292_v55 = vsel %vm287_vm3, %v281_v14, %v282_v48  ;;  %v294_v57 = vsel %vm287_vm3, %v279_v31, %v280_v13  ;;  %v967_v58 = vadd.f32 %v304_v42, %v271_v50  ;;  %v161_v59 = vrot.slane %v952_v49, 1 }
  0x39   : > { %v201_v60 = vrot.slane %v912_v24, 7  ;;  %v243_v61 = vrot.slane %v952_v49, 2  ;;  %v274_v62 = vadd.f32 %v250_v47, %v233_v54  ;;  %v231_v63 = vadd.f32 %v212_v52, %v190_v56  ;;  %p705_p4 = pnand %p704_p3, %p700_p13 }
  0x3a   : > { %v283_v6 = vrot.slane %v912_v24, 6  ;;  %v163_v8 = vrot.slane %v897_v15, 1  ;;  %320 = vrot.lane.b32.xlu0 %v967_v58, %s751_s17  ;;  %v167_v9 = vsel %vm164_vm0, %v160_v35, %v161_v59  ;;  %v203_v13 = vrot.slane %v974_v7, 7 }
  0x3b   : > { %v209_v11 = vsel %vm205_vm1, %v200_v36, %v201_v60  ;;  %v249_v12 = vsel %vm246_vm2, %v242_v40, %v243_v61  ;;  %v986_v14 = vadd.f32 %v292_v55, %v274_v62  ;;  %v272_v16 = vadd.f32 %v252_v53, %v231_v63 }
  0x3c   : > { %v193_v17 = vadd.f32 %v167_v9, %v912_v24  ;;  %v291_v19 = vsel %vm287_vm3, %v282_v48, %v283_v6  ;;  %v172_v20 = vsel %vm164_vm0, %v163_v8, %v156_v18  ;;  %v206_v21 = vsel %vm205_vm1, %v203_v13, %v204_v26 }
  0x3d   : > { %v245_v22 = vrot.slane %v897_v15, 2  ;;  %v285_v23 = vrot.slane %v974_v7, 6  ;;  %v999_v25 = vadd.f32 %v294_v57, %v272_v16  ;;  %v188_v29 = vsel %vm180_vm6, %v172_v20, 0.0 }
  0x3e   : > { %v234_v28 = vadd.f32 %v209_v11, %v193_v17  ;;  %v162_v30 = vrot.slane %v974_v7, 1  ;;  %v196_v31 = vadd.f32 %v188_v29, %v897_v15  ;;  %v202_v33 = vrot.slane %v952_v49, 7 }
  0x3f   : > { %v254_v18 = vsel %vm246_vm2, %v245_v22, %v238_v27  ;;  %v288_v26 = vsel %vm287_vm3, %v285_v23, %v286_v32  ;;  %326 = vrot.lane.b32.xlu1 %v986_v14, %s751_s17  ;;  %v244_v37 = vrot.slane %v974_v7, 2  ;;  %v284_v39 = vrot.slane %v952_v49, 6 }
  0x40   : > { %v275_v34 = vadd.f32 %v249_v12, %v234_v28  ;;  %v270_v35 = vsel %vm262_vm7, %v254_v18, 0.0  ;;  %v165_v36 = vsel %vm164_vm0, %v162_v30, %v163_v8  ;;  %v237_v38 = vadd.f32 %v206_v21, %v196_v31 }
  0x41   : > { %v195_v27 = vadd.f32 %v165_v36, %v974_v7  ;;  %v207_v32 = vsel %vm205_vm1, %v202_v33, %v203_v13  ;;  %v247_v41 = vsel %vm246_vm2, %v244_v37, %v245_v22  ;;  %v166_v5 = vsel %vm164_vm0, %v161_v59, %v162_v30 }
  0x42   : > { %v1023_v40 = vadd.f32 %v291_v19, %v275_v34  ;;  %v208_v42 = vsel %vm205_vm1, %v201_v60, %v202_v33  ;;  %322 = vrot.lane.b32.xlu0 %v999_v25, %s751_s17  ;;  %v278_v43 = vadd.f32 %v270_v35, %v237_v38  ;;  %v194_v46 = vadd.f32 %v166_v5, %v952_v49 }
  0x43   : > { %v236_v44 = vadd.f32 %v207_v32, %v195_v27  ;;  %v289_v47 = vsel %vm287_vm3, %v284_v39, %v285_v23  ;;  %v248_v48 = vsel %vm246_vm2, %v243_v61, %v244_v37  ;;  %v290_v53 = vsel %vm287_vm3, %v283_v6, %v284_v39 }
  0x44   : > { %328 = vrot.lane.b32.xlu2 %v1023_v40, %s751_s17  ;;  %v1040_v50 = vadd.f32 %v288_v26, %v278_v43  ;;  %v235_v52 = vadd.f32 %v208_v42, %v194_v46  ;;  %v1091_v21 = vand.u32 127, %v145_v0 }
  0x45   : > { %v277_v51 = vadd.f32 %v247_v41, %v236_v44 }
  0x46   : > { %v276_v55 = vadd.f32 %v248_v48, %v235_v52  ;;  %vm336_vm8 = vcmp.lt.s32.totalorder %v1091_v21, 127  ;;  %vm369_vm9 = vcmp.ge.s32.totalorder %v1091_v21, 1  ;;  %vm435_vm10 = vcmp.ge.s32.totalorder %v1091_v21, 2 }
  0x47   : > { %v1044_v54 = vadd.f32 %v289_v47, %v277_v51  ;;  %334 = vrot.lane.b32.xlu1 %v1040_v50, %s751_s17  ;;  %vm402_vm11 = vcmp.lt.s32.totalorder %v1091_v21, 126 }
  0x48   : > { %v1048_v56 = vadd.f32 %v290_v53, %v276_v55 }
  0x4a   : > { %332 = vrot.lane.b32.xlu0 %v1044_v54, %s751_s17 }
  0x4c   : > { %330 = vrot.lane.b32.xlu2 %v1048_v56, %s751_s17 }
  0x4f   : > { %357 = vrot.lane.b32.xlu1 %v945_v45, %s752_s25 }
  0x52   : > { %355 = vrot.lane.b32.xlu0 %v999_v25, %s752_s25 }
  0x54   : > { %353 = vrot.lane.b32.xlu2 %v967_v58, %s752_s25 }
  0x57   : > { %363 = vrot.lane.b32.xlu1 %v1048_v56, %s752_s25 }
  0x5a   : > { %361 = vrot.lane.b32.xlu0 %v1023_v40, %s752_s25 }
  0x5c   : > { %359 = vrot.lane.b32.xlu2 %v986_v14, %s752_s25 }
  0x5f   : > { %386 = vrot.lane.b32.xlu1 %v967_v58, %s753_s26 }
  0x62   : > { %367 = vrot.lane.b32.xlu0 %v1040_v50, %s752_s25 }
  0x64   : > { %365 = vrot.lane.b32.xlu2 %v1044_v54, %s752_s25 }
  0x67   : > { %392 = vrot.lane.b32.xlu1 %v986_v14, %s753_s26 }
  0x6a   : > { %390 = vrot.lane.b32.xlu0 %v945_v45, %s753_s26 }
  0x6c   : > { %388 = vrot.lane.b32.xlu2 %v999_v25, %s753_s26 }
  0x6f   : > { %398 = vrot.lane.b32.xlu1 %v1044_v54, %s753_s26 }
  0x72   : > { %396 = vrot.lane.b32.xlu0 %v1048_v56, %s753_s26 }
  0x74   : > { %394 = vrot.lane.b32.xlu2 %v1023_v40, %s753_s26 }
  0x77   : > { %421 = vrot.lane.b32.xlu1 %v999_v25, %s754_s27 }
  0x7a   : > { %419 = vrot.lane.b32.xlu0 %v967_v58, %s754_s27 }
  0x7c   : > { %400 = vrot.lane.b32.xlu2 %v1040_v50, %s753_s26 }
  0x7f   : > { %427 = vrot.lane.b32.xlu1 %v1023_v40, %s754_s27 }
  0x82   : > { %425 = vrot.lane.b32.xlu0 %v986_v14, %s754_s27 }
  0x84   : > { %423 = vrot.lane.b32.xlu2 %v945_v45, %s754_s27 }
  0x87   : > { %433 = vrot.lane.b32.xlu1 %v1040_v50, %s754_s27 }
  0x8a   : > { %431 = vrot.lane.b32.xlu0 %v1044_v54, %s754_s27 }
  0x8c   : > { %429 = vrot.lane.b32.xlu2 %v1048_v56, %s754_s27 }
  0x9e   : > { %v329_v1 = vpop.permute.xlu2 %328 }
  0xa6   : > { %v331_v57 = vpop.permute.xlu2 %330 }
  0xa7   : > { %v342_v37 = vsel %vm336_vm8, %v331_v57, 0.0 }
  0xa8   : > { %v350_v39 = vadd.f32 %v342_v37, %v1048_v56 }
  0xa9   : > { %v325_v59 = vpop.permute.xlu1 %324 }
  0xaa   : > { %v339_v29 = vsel %vm336_vm8, %v325_v59, 0.0 }
  0xab   : > { %v347_v0 = vadd.f32 %v339_v29, %v945_v45 }
  0xac   : > { %v321_v60 = vpop.permute.xlu0 %320 }
  0xad   : > { %v337_v41 = vsel %vm336_vm8, %v321_v60, 0.0 }
  0xae   : > { %v354_v61 = vpop.permute.xlu2 %353  ;;  %v345_v48 = vadd.f32 %v337_v41, %v967_v58  ;;  %v341_v58 = vsel %vm336_vm8, %v329_v1, 0.0 }
  0xaf   : > { %v349_v29 = vadd.f32 %v341_v58, %v1023_v40 }
  0xb1   : > { %v1078_v62 = vpop.permute.xlu1 %326 }
  0xb4   : > { %v323_v63 = vpop.permute.xlu0 %322 }
  0xb5   : > { %v338_v45 = vsel %vm336_vm8, %v323_v63, 0.0 }
  0xb6   : > { %v1080_v6 = vpop.permute.xlu2 %359  ;;  %v346_v43 = vadd.f32 %v338_v45, %v999_v25 }
  0xb9   : > { %v1082_v8 = vpop.permute.xlu1 %334 }
  0xba   : > { %v344_v45 = vsel %vm336_vm8, %v1082_v8, 0.0 }
  0xbc   : > { %v1084_v9 = vpop.permute.xlu0 %332 }
  0xbe   : > { %v1086_v11 = vpop.permute.xlu2 %365 }
  0xc1   : > { %v358_v12 = vpop.permute.xlu1 %357 }
  0xc2   : > { %v372_v30 = vsel %vm369_vm9, %v358_v12, 0.0 }
  0xc3   : > { %v380_v18 = vadd.f32 %v372_v30, %v347_v0 }
  0xc4   : > { %v356_v13 = vpop.permute.xlu0 %355 }
  0xc5   : > { %v371_v5 = vsel %vm369_vm9, %v356_v13, 0.0 }
  0xc6   : > { %v389_v16 = vpop.permute.xlu2 %388  ;;  %v379_v51 = vadd.f32 %v371_v5, %v346_v43 }
  0xc7   : > { %v404_v55 = vsel %vm402_vm11, %v389_v16, 0.0 }
  0xc8   : > { %v412_v63 = vadd.f32 %v404_v55, %v379_v51  ;;  %v376_v55 = vsel %vm369_vm9, %v1086_v11, 0.0 }
  0xc9   : > { %v364_v17 = vpop.permute.xlu1 %363 }
  0xca   : > { %v375_v27 = vsel %vm369_vm9, %v364_v17, 0.0 }
  0xcb   : > { %v383_v44 = vadd.f32 %v375_v27, %v350_v39 }
  0xcc   : > { %v362_v19 = vpop.permute.xlu0 %361 }
  0xcd   : > { %v374_v16 = vsel %vm369_vm9, %v362_v19, 0.0 }
  0xce   : > { %v1088_v20 = vpop.permute.xlu2 %394 }
  0xcf   : > { %v407_v40 = vsel %vm402_vm11, %v1088_v20, 0.0 }
  0xd1   : > { %v387_v22 = vpop.permute.xlu1 %386 }
  0xd2   : > { %v403_v12 = vsel %vm402_vm11, %v387_v22, 0.0  ;;  %v340_v22 = vsel %vm336_vm8, %v1078_v62, 0.0  ;;  %v373_v62 = vsel %vm369_vm9, %v1080_v6, 0.0 }
  0xd4   : > { %v1094_v23 = vpop.permute.xlu0 %367 }
  0xd5   : > { %v377_v6 = vsel %vm369_vm9, %v1094_v23, 0.0 }
  0xd6   : > { %v1096_v28 = vpop.permute.xlu2 %400 }
  0xd9   : > { %v1103_v31 = vpop.permute.xlu1 %392 }
  0xdc   : > { %v391_v26 = vpop.permute.xlu0 %390 }
  0xdd   : > { %v405_v33 = vsel %vm402_vm11, %v391_v26, 0.0  ;;  %v382_v26 = vadd.f32 %v374_v16, %v349_v29 }
  0xde   : > { %v424_v34 = vpop.permute.xlu2 %423  ;;  %v413_v35 = vadd.f32 %v405_v33, %v380_v18 }
  0xdf   : > { %v438_v36 = vsel %vm435_vm10, %v424_v34, 0.0  ;;  %v415_v39 = vadd.f32 %v407_v40, %v382_v26 }
  0xe0   : > { %v446_v38 = vadd.f32 %v438_v36, %v413_v35  ;;  %v348_v35 = vadd.f32 %v340_v22, %v986_v14  ;;  %v406_v14 = vsel %vm402_vm11, %v1103_v31, 0.0  ;;  %v343_v31 = vsel %vm336_vm8, %v1084_v9, 0.0 }
  0xe1   : > { %v1118_v32 = vpop.permute.xlu1 %398 }
  0xe2   : > { %v454_v42 = vmul.f32 0.04, %v446_v38  ;;  %v381_v5 = vadd.f32 %v373_v62, %v348_v35 }
  0xe4   : > { %v462_v46 = vsub.f32 %v875_v3, %v454_v42  ;;  %v397_v47 = vpop.permute.xlu0 %396  ;;  %v370_v3 = vsel %vm369_vm9, %v354_v61, 0.0  ;;  %v352_v42 = vadd.f32 %v344_v45, %v1040_v50  ;;  %v410_v50 = vsel %vm402_vm11, %v1096_v28, 0.0 }
  0xe5   : > { %v408_v52 = vsel %vm402_vm11, %v397_v47, 0.0  ;;  %v378_v17 = vadd.f32 %v370_v3, %v345_v48 }
  0xe6   : > { %v430_v53 = vpop.permute.xlu2 %429  ;;  %v470_v56 = vmul.f32 0.5, %v462_v46  ;;  %v416_v57 = vadd.f32 %v408_v52, %v383_v44  ;;  %v414_v46 = vadd.f32 %v406_v14, %v381_v5  ;;  %v385_v51 = vadd.f32 %v377_v6, %v352_v42 }
  0xe7   : > { %v441_v25 = vsel %vm435_vm10, %v430_v53, 0.0  ;;  %v411_v0 = vadd.f32 %v403_v12, %v378_v17  ;;  %v351_v52 = vadd.f32 %v343_v31, %v1044_v54  ;;  %v409_v54 = vsel %vm402_vm11, %v1118_v32, 0.0 }
  0xe8   : > { %v478_v59 = vadd.f32 0.5, %v470_v56  ;;  %v449_v60 = vadd.f32 %v441_v25, %v416_v57  ;;  %v418_v25 = vadd.f32 %v410_v50, %v385_v51 }
  0xe9   : > { %v422_v13 = vpop.permute.xlu1 %421  ;;  %v384_v28 = vadd.f32 %v376_v55, %v351_v52 }
  0xea   : > { %486 = vst [vmem:[%s1144_s28 + $0x10] sm:$0xff] %v478_v59  ;;  %v457_v61 = vmul.f32 0.04, %v449_v60  ;;  %v437_v1 = vsel %vm435_vm10, %v422_v13, 0.0 }
  0xeb   : > { %v445_v30 = vadd.f32 %v437_v1, %v412_v63 }
  0xec   : > { %v465_v18 = vsub.f32 %v952_v49, %v457_v61  ;;  %v420_v19 = vpop.permute.xlu0 %419 }
  0xed   : > { %v453_v33 = vmul.f32 0.04, %v445_v30  ;;  %v436_v34 = vsel %vm435_vm10, %v420_v19, 0.0 }
  0xee   : > { %v473_v36 = vmul.f32 0.5, %v465_v18  ;;  %v444_v37 = vadd.f32 %v436_v34, %v411_v0 }
  0xef   : > { %v461_v49 = vsub.f32 %v872_v2, %v453_v33 }
  0xf0   : > { %v481_v38 = vadd.f32 0.5, %v473_v36  ;;  %v452_v27 = vmul.f32 0.04, %v444_v37 }
  0xf1   : > { %v469_v20 = vmul.f32 0.5, %v461_v49  ;;  %v428_v41 = vpop.permute.xlu1 %427 }
  0xf2   : > { %489 = vst [vmem:[%s1144_s28 + $0x28] sm:$0xff] %v481_v38  ;;  %v460_v2 = vsub.f32 %v890_v10, %v452_v27  ;;  %v440_v8 = vsel %vm435_vm10, %v428_v41, 0.0 }
  0xf3   : > { %v477_v43 = vadd.f32 0.5, %v469_v20  ;;  %v448_v44 = vadd.f32 %v440_v8, %v415_v39 }
  0xf4   : > { %v468_v47 = vmul.f32 0.5, %v460_v2  ;;  %v426_v48 = vpop.permute.xlu0 %425 }
  0xf5   : > { %485 = vst [vmem:[%s1144_s28 + $0x8] sm:$0xff] %v477_v43  ;;  %v456_v23 = vmul.f32 0.04, %v448_v44  ;;  %v439_v10 = vsel %vm435_vm10, %v426_v48, 0.0 }
  0xf6   : > { %v476_v53 = vadd.f32 0.5, %v468_v47  ;;  %v447_v9 = vadd.f32 %v439_v10, %v414_v46 }
  0xf7   : > { %v464_v56 = vsub.f32 %v912_v24, %v456_v23  ;;  %v417_v24 = vadd.f32 %v409_v54, %v384_v28 }
  0xf8   : > { %484 = vst [vmem:[%s1144_s28] sm:$0xff] %v476_v53  ;;  %v455_v57 = vmul.f32 0.04, %v447_v9 }
  0xf9   : > { %v472_v3 = vmul.f32 0.5, %v464_v56  ;;  %v434_v58 = vpop.permute.xlu1 %433 }
  0xfa   : > { %v463_v59 = vsub.f32 %v878_v4, %v455_v57  ;;  %v443_v11 = vsel %vm435_vm10, %v434_v58, 0.0 }
  0xfb   : > { %v480_v60 = vadd.f32 0.5, %v472_v3  ;;  %v451_v63 = vadd.f32 %v443_v11, %v418_v25 }
  0xfc   : > { %v471_v12 = vmul.f32 0.5, %v463_v59  ;;  %v432_v13 = vpop.permute.xlu0 %431 }
  0xfd   : > { %488 = vst [vmem:[%s1144_s28 + $0x20] sm:$0xff] %v480_v60  ;;  %v459_v17 = vmul.f32 0.04, %v451_v63  ;;  %v442_v32 = vsel %vm435_vm10, %v432_v13, 0.0 }
  0xfe   : > { %v479_v16 = vadd.f32 0.5, %v471_v12  ;;  %v450_v61 = vadd.f32 %v442_v32, %v417_v24 }
  0xff   : > { %v467_v4 = vsub.f32 %v897_v15, %v459_v17 }
 0x100   : > { %487 = vst [vmem:[%s1144_s28 + $0x18] sm:$0xff] %v479_v16  ;;  %v458_v1 = vmul.f32 0.04, %v450_v61 }
 0x101   : > { %v475_v29 = vmul.f32 0.5, %v467_v4 }
 0x102   : > { %v466_v22 = vsub.f32 %v974_v7, %v458_v1 }
 0x103   : > { %v483_v21 = vadd.f32 0.5, %v475_v29 }
 0x104   : > { %v474_v30 = vmul.f32 0.5, %v466_v22 }
 0x105   : > { %491 = vst [vmem:[%s1144_s28 + $0x38] sm:$0xff] %v483_v21 }
 0x106   : > { %v482_v0 = vadd.f32 0.5, %v474_v30 }
 0x108   : > { %490 = vst [vmem:[%s1144_s28 + $0x30] sm:$0xff] %v482_v0 }
 0x109   : > { %708 = shalt.err (!%p705_p4)
}
 0x10a   : > { %s755_s21 = smov 128   ;;  %s756_s24 = smov 8  }
 0x10b   : > { %599 = dma.vmem_to_hbm [thread:$0]  (%p816_p10), %s506_s10, 1024, %s508_s4, %s493_s5, %s755_s21, %s755_s21, %s756_s24  }
 0x10c PF: > { %p610_p5 = scmp.ge.s32.totalorder %s747_s9, 2  ;;  %s522_s17 = sand.u32 1, %s735_s6  }
 0x10d   : > { %s523_s25 = scalar_lea.sflag [#allocation4], %s522_s17 }
 0x10e   : > { %p606_p7 = pnand %p610_p5, %p820_p11 }
 0x110   : > { %p607_p8 = pneg %p606_p7 }
 0x112   : > { %730 = dma.done.wait (%p607_p8), %s523_s25, 1024  }
 0x113   : > { %732 = vsyncadd (%p607_p8), %s523_s25, 4294966272  ;;  %p14_p9 = scmp.ge.s32.totalorder %s792_s12, 8   ;;  %s1247_s6 = smov %s739_s7 }
 0x114   : > { %s1248_s7 = smov %s743_s8  ;;  %s1249_s8 = smov %s804_s15 }
 0x115   : > { %s1250_s9 = smov %s792_s12  ;;  %16 = sbr.rel (!%p14_p9) target bundleno = 5 (0x5), region = 69 }
 0x11a   :  { %529 = vsyncpa [#allocation3], 1 }
 0x11b   :  { %531 = vsyncpa [#allocation3 + $0x1], 1 }
 0x11c   :  { %532 = vsyncpa [#allocation4], 1 }
 0x11d   :  { %534 = vsyncpa [#allocation4 + $0x1], 1 }

</bundles_post_ra>
